<compile_context>
chip_gen: v5e
topology: v5e:2x2
jax: 0.10.0
libtpu: 0.0.40
codegen_flags: <defaults>
</compile_context>

<pallas_src>
import jax
import jax.numpy as jnp
from jax import lax
from jax.experimental import pallas as pl
from jax.experimental.pallas import tpu as pltpu

# Module hyper-parameters (defaults of the PyTorch module, small batch).
B = 2        # batch size
SEQ = 10     # seq_length
EMB = 32     # embedding_size
L = 4        # max filter height


def caser_hconv_kernel(x_ref, w_ref, b_ref, o_ref):
    """
    x_ref : (S*TB, E)  bf16  time-major within the tile: row r = t*TB + b
    w_ref : (L*E, L)   bf16  column k = concat_j w_k[j], zero-padded for j>k
    b_ref : (1, L)     f32   per-filter bias
    o_ref : (TB, L)    f32   output tile
    """
    rows, _ = x_ref.shape
    tb, n_filt = o_ref.shape
    seq = rows // tb

    x = x_ref[...]                                          # (rows, E) bf16

    # --- im2col: shifted[j][r, :] = x[r + j*TB, :] (wrap within the tile);
    # shift is a whole-sublane-tile row offset when TB % 8 == 0.  Lane-concat
    # of the L copies -> (rows, L*E) = exactly 128 lanes here.
    shifted = [x]
    for j in range(1, n_filt):
        r = j * tb
        shifted.append(jnp.concatenate([x[r:, :], x[:r, :]], axis=0))
    xs = jnp.concatenate(shifted, axis=-1)                  # (rows, L*E) bf16

    # --- single MXU matmul: bf16 operands, f32 accumulation ---
    p = jnp.dot(xs, w_ref[...],
                preferred_element_type=jnp.float32)         # (rows, L) f32

    # --- bias + ReLU, once, vectorized over the whole tile ---
    act = jnp.maximum(p + b_ref[...], 0.0)                  # (rows, L), >= 0

    # --- max-pool over time: O(S) contiguous (TB, L) slabs.
    # Filter column k is valid at time t iff t + k < S.  ReLU output >= 0, so
    # masking invalid (wrapped-garbage) entries to 0 never changes the max of
    # the non-empty valid set (S >= L asserted in the wrapper).
    col = lax.broadcasted_iota(jnp.int32, (tb, n_filt), 1)  # hoisted iota
    m = act[0:tb, :]                                        # t = 0: all valid
    for t in range(1, seq):                                 # static, S steps
        slab = act[t * tb:(t + 1) * tb, :]
        n_valid = seq - t
        if n_valid < n_filt:                                # only last L-1 t's
            slab = jnp.where(col < n_valid, slab, 0.0)
        m = jnp.maximum(m, slab)
    o_ref[...] = m.astype(o_ref.dtype)


def _choose_batch_tile(b, s, *, target_rows=4096):
    """Batch tile: ~target_rows time-major rows per grid step, divides b,
    multiple of 8 unless it is the whole batch, grid >= 2 when b >= 16 so
    v7x megacore gets balanced work."""
    if b <= 8 or b % 8 != 0:
        return b                                   # tiny / odd batch: one step
    cap = max(8, min(b // 2, (target_rows // s) // 8 * 8))
    tb = 8
    for cand in range(8, cap + 1, 8):
        if b % cand == 0:
            tb = cand
    return tb


def hconv_pallas(x_bse, w_col, bias_row, *, batch_tile=None, target_rows=4096):
    """x_bse (B,S,E) f32/bf16, w_col (L*E,L) bf16, bias_row (1,L) f32 -> (B,L) f32."""
    b, s, e = x_bse.shape
    n_filt = w_col.shape[1]
    assert s >= n_filt, "need seq_length >= L (otherwise some filters are empty)"

    tb = batch_tile if batch_tile is not None else _choose_batch_tile(
        b, s, target_rows=target_rows)
    assert b % tb == 0, "batch must be a multiple of the batch tile"
    assert tb == b or tb % 8 == 0, "partial batch tiles must be multiples of 8"
    g = b // tb
    rows = s * tb

    # Host-side layout plumbing: per grid group, time-major rows (r = t*TB+b),
    # cast to bf16 so the only streamed operand moves half the HBM bytes.
    x_tm = (x_bse.astype(jnp.bfloat16)
                 .reshape(g, tb, s, e)
                 .transpose(0, 2, 1, 3)                     # (G, S, TB, E)
                 .reshape(g * rows, e))                     # (G*S*TB, E)

    # Per-step VMEM estimate (double-buffered bf16 input, bf16 im2col slab +
    # shifted copies, lane-padded f32 matmul/ReLU temporaries); weights/bias
    # are tiny and resident.  Sized so it fits v7x's 64 MiB with headroom.
    est = (2 * rows * e * 2
           + 2 * rows * (n_filt * e) * 2
           + 2 * rows * 128 * 4)
    vmem_limit = int(min(64 << 20, max(32 << 20, 2 * est)))

    # TODO(synk): if a profile on very large batches still shows exposed input
    # DMA, add pipeline_mode=pl.Buffered(3) on the input BlockSpec only.
    return pl.pallas_call(
        caser_hconv_kernel,
        out_shape=jax.ShapeDtypeStruct((b, n_filt), jnp.float32),
        grid=(g,),
        in_specs=[
            pl.BlockSpec((rows, e), lambda i: (i, 0)),             # streamed x
            pl.BlockSpec((n_filt * e, n_filt), lambda i: (0, 0)),  # weights
            pl.BlockSpec((1, n_filt), lambda i: (0, 0)),           # bias row
        ],
        out_specs=pl.BlockSpec((tb, n_filt), lambda i: (i, 0)),
        compiler_params=pltpu.CompilerParams(
            dimension_semantics=("parallel",),          # v7x: use both TCs
            vmem_limit_bytes=vmem_limit),
    )(x_tm, w_col, bias_row)


def pack_params(weights, biases):
    """Host-side layout plumbing: L conv weights -> (L*E, L) bf16 + (1, L) f32."""
    n_filt = len(weights)
    e = weights[0].shape[-1]
    w_col = jnp.zeros((n_filt * e, n_filt), jnp.float32)
    for k in range(n_filt):                  # filter height k+1
        for j in range(k + 1):               # filter row j
            w_col = w_col.at[j * e:(j + 1) * e, k].set(weights[k][j])
    bias_row = jnp.stack(biases).reshape(1, n_filt).astype(jnp.float32)
    return w_col.astype(jnp.bfloat16), bias_row


def ref_forward(x_bse, weights, biases):
    """Pure-JAX (f32, VPU-only) reference mirroring the PyTorch forward."""
    b, s, _ = x_bse.shape
    outs = []
    for k in range(len(weights)):
        w = weights[k]                                      # (k+1, E)
        tk = s - k
        acc = jnp.zeros((b, tk), jnp.float32)
        for j in range(k + 1):
            acc = acc + jnp.sum(x_bse[:, j:j + tk, :] * w[j][None, None, :],
                                axis=-1)
        acc = jnp.maximum(acc + biases[k], 0.0)
        outs.append(jnp.max(acc, axis=1))
    return jnp.stack(outs, axis=1)


if __name__ == "__main__":
    key = jax.random.PRNGKey(0)
    kx, kx16, *kws = jax.random.split(key, 2 + 2 * L)

    # Input in the PyTorch NCHW convention: (B, 1, SEQ, EMB).
    x_nchw = jax.random.normal(kx, (B, 1, SEQ, EMB), dtype=jnp.float32)
    x_bse = x_nchw[:, 0, :, :]                              # squeeze channel

    # Conv2d(1, 1, (i, EMB)) -> weight (i, EMB), bias ().
    weights, biases = [], []
    for i in range(1, L + 1):
        kw, kb = kws[2 * (i - 1)], kws[2 * (i - 1) + 1]
        weights.append(0.1 * jax.random.normal(kw, (i, EMB), dtype=jnp.float32))
        biases.append(0.1 * jax.random.normal(kb, (), dtype=jnp.float32))

    w_col, bias_row = pack_params(weights, biases)

    # --- demo shape (B=2): single grid step ---
    out = jax.block_until_ready(hconv_pallas(x_bse, w_col, bias_row))
    assert out.shape == (B, L)

    # Tight check: reference fed the same bf16-rounded operands the MXU sees.
    x_q = x_bse.astype(jnp.bfloat16).astype(jnp.float32)
    w_q = [w.astype(jnp.bfloat16).astype(jnp.float32) for w in weights]
    ref_tight = ref_forward(x_q, w_q, biases)
    assert jnp.allclose(out, ref_tight, atol=1e-4, rtol=1e-4), (out, ref_tight)

    # Loose sanity check against the pure-f32 PyTorch-equivalent reference.
    ref_f32 = ref_forward(x_bse, weights, biases)
    assert jnp.allclose(out, ref_f32, atol=5e-2, rtol=5e-2), (out, ref_f32)

    # --- small multi-tile shape (B=16): exercises tb=8, grid=2 (megacore path)
    x16 = jax.random.normal(kx16, (16, SEQ, EMB), dtype=jnp.float32)
    out16 = jax.block_until_ready(hconv_pallas(x16, w_col, bias_row))
    x16_q = x16.astype(jnp.bfloat16).astype(jnp.float32)
    ref16 = ref_forward(x16_q, w_q, biases)
    assert out16.shape == (16, L)
    assert jnp.allclose(out16, ref16, atol=1e-4, rtol=1e-4), (out16, ref16)

    print("KERNEL_OK")
</pallas_src>

<mosaic_0001>
module attributes {stable_mosaic.version = 11 : i64} {
  func.func @caser_hconv_kernel(%arg0: i32, %arg1: memref<20x32xbf16, #tpu.memory_space<vmem>>, %arg2: memref<128x4xbf16, #tpu.memory_space<vmem>>, %arg3: memref<1x4xf32, #tpu.memory_space<vmem>>, %arg4: memref<2x4xf32, #tpu.memory_space<vmem>>) attributes {dimension_semantics = [#tpu.dimension_semantics<parallel>], iteration_bounds = array<i64: 1>, scalar_prefetch = 0 : i64, scratch_operands = 0 : i64, tpu.core_type = #tpu.core_type<tc>, window_params = [{transform_indices = @transform_0, window_bounds = array<i64: 20, 32>}, {pipeline_mode = #tpu.pipeline_mode<synchronous>, transform_indices = @transform_1, window_bounds = array<i64: 128, 4>}, {pipeline_mode = #tpu.pipeline_mode<synchronous>, transform_indices = @transform_2, window_bounds = array<i64: 1, 4>}, {transform_indices = @transform_3, window_bounds = array<i64: 2, 4>}]} {
    %c0 = arith.constant 0 : index
    %c0_0 = arith.constant 0 : index
    %0 = vector.load %arg1[%c0, %c0_0] : memref<20x32xbf16, #tpu.memory_space<vmem>>, vector<20x32xbf16>
    %1 = vector.extract_strided_slice %0 {offsets = [2, 0], sizes = [18, 32], strides = [1, 1]} : vector<20x32xbf16> to vector<18x32xbf16>
    %2 = vector.extract_strided_slice %0 {offsets = [0, 0], sizes = [2, 32], strides = [1, 1]} : vector<20x32xbf16> to vector<2x32xbf16>
    %3 = tpu.concatenate %1, %2 in 0 : vector<18x32xbf16>, vector<2x32xbf16> -> vector<20x32xbf16>
    %4 = vector.extract_strided_slice %0 {offsets = [4, 0], sizes = [16, 32], strides = [1, 1]} : vector<20x32xbf16> to vector<16x32xbf16>
    %5 = vector.extract_strided_slice %0 {offsets = [0, 0], sizes = [4, 32], strides = [1, 1]} : vector<20x32xbf16> to vector<4x32xbf16>
    %6 = tpu.concatenate %4, %5 in 0 : vector<16x32xbf16>, vector<4x32xbf16> -> vector<20x32xbf16>
    %7 = vector.extract_strided_slice %0 {offsets = [6, 0], sizes = [14, 32], strides = [1, 1]} : vector<20x32xbf16> to vector<14x32xbf16>
    %8 = vector.extract_strided_slice %0 {offsets = [0, 0], sizes = [6, 32], strides = [1, 1]} : vector<20x32xbf16> to vector<6x32xbf16>
    %9 = tpu.concatenate %7, %8 in 0 : vector<14x32xbf16>, vector<6x32xbf16> -> vector<20x32xbf16>
    %10 = tpu.concatenate %0, %3, %6, %9 in 1 : vector<20x32xbf16>, vector<20x32xbf16>, vector<20x32xbf16>, vector<20x32xbf16> -> vector<20x128xbf16>
    %c0_1 = arith.constant 0 : index
    %c0_2 = arith.constant 0 : index
    %11 = vector.load %arg2[%c0_1, %c0_2] : memref<128x4xbf16, #tpu.memory_space<vmem>>, vector<128x4xbf16>
    %cst = arith.constant dense<0.000000e+00> : vector<20x4xf32>
    %12 = tpu.matmul %10, %11, %cst {dimension_numbers = #tpu.dot_dimension_numbers<[1], [0], [0], [1], [0, 0, 1, 1], [], []>} : vector<20x128xbf16>, vector<128x4xbf16>, vector<20x4xf32> -> vector<20x4xf32>
    %c0_3 = arith.constant 0 : index
    %c0_4 = arith.constant 0 : index
    %13 = vector.load %arg3[%c0_3, %c0_4] : memref<1x4xf32, #tpu.memory_space<vmem>>, vector<1x4xf32>
    %14 = vector.broadcast %13 : vector<1x4xf32> to vector<20x4xf32>
    %15 = arith.addf %12, %14 : vector<20x4xf32>
    %cst_5 = arith.constant 0.000000e+00 : f32
    %16 = vector.broadcast %cst_5 : f32 to vector<20x4xf32>
    %17 = arith.maximumf %15, %16 : vector<20x4xf32>
    %18 = tpu.iota {dimensions = array<i32: 1>} : vector<2x4xi32>
    %19 = vector.extract_strided_slice %17 {offsets = [0, 0], sizes = [2, 4], strides = [1, 1]} : vector<20x4xf32> to vector<2x4xf32>
    %20 = vector.extract_strided_slice %17 {offsets = [2, 0], sizes = [2, 4], strides = [1, 1]} : vector<20x4xf32> to vector<2x4xf32>
    %21 = arith.maximumf %19, %20 : vector<2x4xf32>
    %22 = vector.extract_strided_slice %17 {offsets = [4, 0], sizes = [2, 4], strides = [1, 1]} : vector<20x4xf32> to vector<2x4xf32>
    %23 = arith.maximumf %21, %22 : vector<2x4xf32>
    %24 = vector.extract_strided_slice %17 {offsets = [6, 0], sizes = [2, 4], strides = [1, 1]} : vector<20x4xf32> to vector<2x4xf32>
    %25 = arith.maximumf %23, %24 : vector<2x4xf32>
    %26 = vector.extract_strided_slice %17 {offsets = [8, 0], sizes = [2, 4], strides = [1, 1]} : vector<20x4xf32> to vector<2x4xf32>
    %27 = arith.maximumf %25, %26 : vector<2x4xf32>
    %28 = vector.extract_strided_slice %17 {offsets = [10, 0], sizes = [2, 4], strides = [1, 1]} : vector<20x4xf32> to vector<2x4xf32>
    %29 = arith.maximumf %27, %28 : vector<2x4xf32>
    %30 = vector.extract_strided_slice %17 {offsets = [12, 0], sizes = [2, 4], strides = [1, 1]} : vector<20x4xf32> to vector<2x4xf32>
    %31 = arith.maximumf %29, %30 : vector<2x4xf32>
    %32 = vector.extract_strided_slice %17 {offsets = [14, 0], sizes = [2, 4], strides = [1, 1]} : vector<20x4xf32> to vector<2x4xf32>
    %c3_i32 = arith.constant 3 : i32
    %33 = vector.broadcast %c3_i32 : i32 to vector<2x4xi32>
    %34 = arith.cmpi slt, %18, %33 : vector<2x4xi32>
    %cst_6 = arith.constant 0.000000e+00 : f32
    %35 = vector.broadcast %cst_6 : f32 to vector<2x4xf32>
    %36 = arith.select %34, %32, %35 : vector<2x4xi1>, vector<2x4xf32>
    %37 = arith.maximumf %31, %36 : vector<2x4xf32>
    %38 = vector.extract_strided_slice %17 {offsets = [16, 0], sizes = [2, 4], strides = [1, 1]} : vector<20x4xf32> to vector<2x4xf32>
    %c2_i32 = arith.constant 2 : i32
    %39 = vector.broadcast %c2_i32 : i32 to vector<2x4xi32>
    %40 = arith.cmpi slt, %18, %39 : vector<2x4xi32>
    %cst_7 = arith.constant 0.000000e+00 : f32
    %41 = vector.broadcast %cst_7 : f32 to vector<2x4xf32>
    %42 = arith.select %40, %38, %41 : vector<2x4xi1>, vector<2x4xf32>
    %43 = arith.maximumf %37, %42 : vector<2x4xf32>
    %44 = vector.extract_strided_slice %17 {offsets = [18, 0], sizes = [2, 4], strides = [1, 1]} : vector<20x4xf32> to vector<2x4xf32>
    %c1_i32 = arith.constant 1 : i32
    %45 = vector.broadcast %c1_i32 : i32 to vector<2x4xi32>
    %46 = arith.cmpi slt, %18, %45 : vector<2x4xi32>
    %cst_8 = arith.constant 0.000000e+00 : f32
    %47 = vector.broadcast %cst_8 : f32 to vector<2x4xf32>
    %48 = arith.select %46, %44, %47 : vector<2x4xi1>, vector<2x4xf32>
    %49 = arith.maximumf %43, %48 : vector<2x4xf32>
    %c0_9 = arith.constant 0 : index
    %c0_10 = arith.constant 0 : index
    %50 = vector.load %arg4[%c0_9, %c0_10] : memref<2x4xf32, #tpu.memory_space<vmem>>, vector<2x4xf32>
    tpu.vector_store %arg4[%c0_9, %c0_10], %49 {strides = array<i32>} : memref<2x4xf32, #tpu.memory_space<vmem>>, vector<2x4xf32>,
    return
  }
  func.func @transform_0(%arg0: i32) -> (i32, i32) {
    %c0_i32 = arith.constant 0 : i32
    %c0_i32_0 = arith.constant 0 : i32
    return %arg0, %c0_i32 : i32, i32
  }
  func.func @transform_1(%arg0: i32) -> (i32, i32) {
    %c0_i32 = arith.constant 0 : i32
    %c0_i32_0 = arith.constant 0 : i32
    %c0_i32_1 = arith.constant 0 : i32
    return %c0_i32, %c0_i32_0 : i32, i32
  }
  func.func @transform_2(%arg0: i32) -> (i32, i32) {
    %c0_i32 = arith.constant 0 : i32
    %c0_i32_0 = arith.constant 0 : i32
    %c0_i32_1 = arith.constant 0 : i32
    return %c0_i32, %c0_i32_0 : i32, i32
  }
  func.func @transform_3(%arg0: i32) -> (i32, i32) {
    %c0_i32 = arith.constant 0 : i32
    %c0_i32_0 = arith.constant 0 : i32
    return %arg0, %c0_i32 : i32, i32
  }
}

</mosaic_0001>

<bundles_post_ra>
// kernel: tpu_custom_call.1
= control target key start
LH: loop header
LB: loop body
LE: loop exit
PB: predicated region body
PF: predicated region fallthrough
CT: control target
= control target key end

     0   :  { %s303_s20 = smov 64   ;;  %s374_s0 = inlined_call_operand.vmem [shape: bf16[20,32], index: 0, kind: input, shape index: {}]   ;;  %s375_s1 = inlined_call_operand.vmem [shape: bf16[128,4], index: 1, kind: input, shape index: {}]   ;;  %s376_s2 = inlined_call_operand.vmem [shape: f32[1,4], index: 2, kind: input, shape index: {}]   ;;  %s377_s3 = inlined_call_operand.hbm [shape: f32[2,4], index: 3, kind: output, shape index: {}]  }
   0x1   :  { %v15_v0 = vld [vmem:[%s374_s0] sm:$0xf]  ;;  %v16_v1 = vld [vmem:[%s374_s0 + $0x4] sm:$0xf]  ;;  %v17_v2 = vld [vmem:[%s374_s0 + $0x8] sm:$0x3] }
   0x2   :  { %v21_v3 = vunpack.c.l.b16 %v15_v0  ;;  %v22_v4 = vunpack.c.l.b16 %v16_v1  ;;  %v23_v5 = vunpack.c.l.b16 %v17_v2  ;;  %v263_v6 = vld [vmem:[%s375_s1 + $0x38] sm:$0xff]  ;;  %56 = vrot.lane.b32.xlu2 %v15_v0, %s303_s20  ;;  %v262_v10 = vld [vmem:[%s375_s1 + $0x30] sm:$0xff] }
   0x3   :  { %150 = vmatpush.bf16.msra.mxu0 %v263_v6 }
   0x4   :  { %v24_v7 = vpack.c.b16 %v22_v4, %v21_v3  ;;  %v339_v8 = vpack.c.b16 %v23_v5, %v23_v5  ;;  %v30_v9 = vpack.c.b16 %v21_v3, %v21_v3 }
   0x5   :  { %8 = vsyncpa [#allocation3], 0  ;;  %vm26_vm0 = vcmask 1046528   ;;  %vm40_vm1 = vcmask 1044480   ;;  %264 = vmatpush.bf16.msra.mxu1 %v263_v6  ;;  %v261_v18 = vld [vmem:[%s375_s1 + $0x28] sm:$0xff]  ;;  %s304_s24 = smov 32   ;;  %v171_v47 = vlaneseq }
   0x6   :  { %v27_v11 = vrot.slane %v24_v7, 1  ;;  %v28_v12 = vrot.slane %v339_v8, 1  ;;  %v41_v13 = vrot.slane %v24_v7, 3  ;;  %v42_v14 = vrot.slane %v339_v8, 3  ;;  %s305_s25 = smov 96   ;;  %v260_v23 = vld [vmem:[%s375_s1 + $0x20] sm:$0xff] }
   0x7   :  { %v44_v15 = vrot.slane %v30_v9, 1  ;;  %151 = vmatpush.bf16.msra.mxu0 %v262_v10  ;;  %v37_v20 = vrot.slane %v24_v7, 2  ;;  %v38_v21 = vrot.slane %v339_v8, 2  ;;  %vm36_vm2 = vcmask 1045504   ;;  %v259_v26 = vld [vmem:[%s375_s1 + $0x18] sm:$0xff]  ;;  %v258_v27 = vld [vmem:[%s375_s1 + $0x10] sm:$0xff] }
   0x8   :  { %v29_v16 = vsel %vm26_vm0, %v27_v11, %v28_v12  ;;  %v43_v17 = vsel %vm40_vm1, %v41_v13, %v42_v14  ;;  %v31_v22 = vrot.slane %v30_v9, 7  ;;  %vm32_vm3 = vcmask 1040384   ;;  %v257_v28 = vld [vmem:[%s375_s1 + $0x8] sm:$0xff]  ;;  %v256_v29 = vld [vmem:[%s375_s1] sm:$0xff]  ;;  %s215_s13 = sshll.u32 %s377_s3, 4  ;;  %s216_s13 = int_to_ptr.hbm [resolvable:$true] %s215_s13 }
   0x9   :  { %50 = vrot.lane.b32.xlu0 %v29_v16, %s304_s24  ;;  %v48_v19 = vsel %vm26_vm0, %v43_v17, %v44_v15  ;;  %265 = vmatpush.bf16.msra.mxu1 %v262_v10  ;;  %v39_v24 = vsel %vm36_vm2, %v37_v20, %v38_v21  ;;  %vm63_vm4 = vcmask 261120   ;;  %vm70_vm5 = vcmask 523264   ;;  %v276_v42 = vld [vmem:[%s376_s2] ss:$0 sm:$0xff]  ;;  %s306_s2 = smov [#allocation2]  }
   0xa   :  { %59 = vrot.lane.b32.xlu1 %v48_v19, %s305_s25  ;;  %61 = vrot.lane.b32.xlu2 %v44_v15, %s305_s25  ;;  %v35_v25 = vsel %vm32_vm3, %v28_v12, %v31_v22  ;;  %vm75_vm6 = vcmask 785408   ;;  %v172_v51 = vand.u32 127, %v171_v47  ;;  %s213_s10 = sshll.u32 %s306_s2, 4  ;;  %vm206_vm10 = vcmask 25600   ;;  %s214_s10 = int_to_ptr.vmem [resolvable:$true] %s213_s10 }
   0xb   :  { %152 = vmatpush.bf16.msra.mxu0 %v261_v18 }
   0xc   :  { %vm191_vm7 = vcmp.lt.s32.totalorder %v172_v51, 3  ;;  %vm200_vm8 = vcmp.lt.s32.totalorder %v172_v51, 1  ;;  %vm197_vm9 = vcmp.lt.s32.totalorder %v172_v51, 2 }
   0xd   :  { %266 = vmatpush.bf16.msra.mxu1 %v261_v18 }
   0xf   :  { %153 = vmatpush.bf16.msra.mxu0 %v260_v23 }
  0x11   :  { %54 = vrot.lane.b32.xlu0 %v39_v24, %s303_s20  ;;  %267 = vmatpush.bf16.msra.mxu1 %v260_v23 }
  0x12   :  { %52 = vrot.lane.b32.xlu1 %v35_v25, %s304_s24 }
  0x13   :  { %154 = vmatpush.bf16.msra.mxu0 %v259_v26 }
  0x15   :  { %268 = vmatpush.bf16.msra.mxu1 %v259_v26 }
  0x17   :  { %155 = vmatpush.bf16.msra.mxu0 %v258_v27 }
  0x19   :  { %269 = vmatpush.bf16.msra.mxu1 %v258_v27 }
  0x1b   :  { %156 = vmatpush.bf16.msra.mxu0 %v257_v28 }
  0x1d   :  { %270 = vmatpush.bf16.msra.mxu1 %v257_v28 }
  0x1f   :  { %157 = vmatpush.bf16.msra.mxu0 %v256_v29 }
  0x21   :  { %271 = vmatpush.bf16.msra.mxu1 %v256_v29 }
  0x5c   :  { %v57_v30 = vpop.permute.xlu2 %56 }
  0x64   :  { %v62_v37 = vpop.permute.xlu2 %61 }
  0x7b   :  { %v51_v31 = vpop.permute.xlu0 %50 }
  0x7c   :  { %v60_v32 = vpop.permute.xlu1 %59  ;;  %v66_v33 = vsel %vm63_vm4, %v24_v7, %v51_v31 }
  0x83   :  { %v55_v34 = vpop.permute.xlu0 %54 }
  0x84   :  { %v72_v35 = vsel %vm70_vm5, %v66_v33, %v55_v34  ;;  %v53_v36 = vpop.permute.xlu1 %52 }
  0x85   :  { %v69_v38 = vsel %vm63_vm4, %v339_v8, %v53_v36  ;;  %v77_v39 = vsel %vm75_vm6, %v72_v35, %v60_v32 }
  0x86   :  { %158 = vmatmul.bf16.vlgmr.msra.gmra.mxu0 %v77_v39  ;;  %v74_v40 = vsel %vm70_vm5, %v69_v38, %v57_v30 }
  0x87   :  { %v80_v41 = vsel %vm75_vm6, %v74_v40, %v62_v37 }
  0x88   :  { %163 = vmatmul.bf16.vlgmr.msra.gmra.mxu1 %v80_v41 }
 0x103   :  { %v159_v43 = vpop.f32.mrf.mxu0 }
 0x104   :  { %v160_v44 = vadd.f32 %v276_v42, %v159_v43 }
 0x105   :  { %v164_v45 = vpop.f32.mrf.mxu1 }
 0x106   :  { %v168_v46 = vmax.f32 %v160_v44, 0.0  ;;  %v165_v56 = vadd.f32 %v276_v42, %v164_v45 }
 0x108   :  { %v174_v48 = vrot.slane %v168_v46, 2  ;;  %v177_v50 = vrot.slane %v168_v46, 4  ;;  %v180_v54 = vrot.slane %v168_v46, 6  ;;  %v170_v62 = vmax.f32 %v165_v56, 0.0 }
 0x10a   :  { %v176_v49 = vmax.f32 %v168_v46, %v174_v48  ;;  %v201_v4 = vsel %vm200_vm8, %v170_v62, 0.0  ;;  %v198_v6 = vsel %vm197_vm9, %v170_v62, 0.0 }
 0x10b   :  { %v161_v52 = vpop.f32.mrf.mxu0  ;;  %v203_v7 = vrot.slane %v201_v4, 2 }
 0x10c   :  { %v179_v53 = vmax.f32 %v176_v49, %v177_v50  ;;  %v162_v55 = vadd.f32 %v276_v42, %v161_v52 }
 0x10d   :  { %v166_v57 = vpop.f32.mrf.mxu1 }
 0x10e   :  { %v169_v58 = vmax.f32 %v162_v55, 0.0  ;;  %v182_v59 = vmax.f32 %v179_v53, %v180_v54 }
 0x110   :  { %v183_v60 = vmax.f32 %v182_v59, %v169_v58  ;;  %v185_v61 = vrot.slane %v169_v58, 2  ;;  %v192_v63 = vsel %vm191_vm7, %v169_v58, 0.0  ;;  %v188_v1 = vrot.slane %v169_v58, 4 }
 0x111   :  { %v194_v3 = vrot.slane %v192_v63, 6 }
 0x112   :  { %v187_v0 = vmax.f32 %v183_v60, %v185_v61 }
 0x114   :  { %v190_v2 = vmax.f32 %v187_v0, %v188_v1 }
 0x116   :  { %v196_v5 = vmax.f32 %v190_v2, %v194_v3 }
 0x118   :  { %v199_v8 = vmax.f32 %v196_v5, %v198_v6 }
 0x11a   :  { %v205_v9 = vmax.f32 %v199_v8, %v203_v7 }
 0x11c   :  { %207 = vst.msk [vmem:[#allocation2] sm:$0x3] %vm206_vm10, %v205_v9 }
 0x11d   :  { %218 = dma.vmem_to_hbm [thread:$0]  %s214_s10, 32, %s216_s13, [#allocation3]  }
 0x11e   :  { %301 = dma.done.wait [#allocation3], 32  }
 0x11f   :  { %302 = vsyncadd [#allocation3], 4294967264 }
 0x120   :  { %223 = vsyncpa [#allocation3], 1 }

</bundles_post_ra>
